<compile_context>
chip_gen: v7x
topology: tpu7x:2x2x1
jax: 0.10.0
libtpu: 0.0.40
codegen_flags: <defaults>
</compile_context>

<pallas_src>
import jax
import jax.numpy as jnp
from jax.experimental import pallas as pl
from jax.experimental.pallas import tpu as pltpu


def _qfunc_kernel(obs_ref, act_ref, w1o_ref, w1a_ref, b1_ref,
                  w2_ref, b2_ref, w3_ref, b3_ref, out_ref):
    # Batch lives on the lane axis: every activation is (features, TILE_B).
    # Layer 1: concat([obs, act]) @ W1  ==  W1o^T @ obs^T + W1a^T @ act^T
    h1 = (jnp.dot(w1o_ref[...], obs_ref[...], preferred_element_type=jnp.float32)
          + jnp.dot(w1a_ref[...], act_ref[...], preferred_element_type=jnp.float32)
          + b1_ref[...])
    h1 = jnp.maximum(h1, 0.0).astype(w2_ref.dtype)          # ReLU (lane-dense)

    h2 = jnp.dot(w2_ref[...], h1, preferred_element_type=jnp.float32) + b2_ref[...]
    h2 = jnp.maximum(h2, 0.0).astype(w3_ref.dtype)           # ReLU (lane-dense)

    # Width-1 head: (1, h2) @ (h2, TILE_B) -> lane-dense (1, TILE_B) row.
    q = jnp.dot(w3_ref[...], h2, preferred_element_type=jnp.float32) + b3_ref[...]
    out_ref[...] = q.astype(out_ref.dtype)


def _round_up(x, m):
    return (x + m - 1) // m * m


def mlp_q_function(obs, act, params, *, tile_b=None, compute_dtype=jnp.float32):
    """Pallas forward pass of MLPQFunction. Returns shape (batch,)."""
    w1, b1, w2, b2, w3, b3 = params
    B, obs_dim = obs.shape
    act_dim = act.shape[1]
    h1_dim = w1.shape[1]
    h2_dim = w2.shape[1]

    # ---- batch tile: lane axis -> multiple of 128 --------------------------
    # The kernel is per-grid-step-overhead bound at these widths, so use big
    # tiles (few steps) but keep >=2 steps when B allows so v7x megacore can
    # split the batch across both TensorCores. VMEM is never binding here.
    if tile_b is None:
        b128 = _round_up(B, 128)
        tile_b = min(4096, max(128, _round_up(pl.cdiv(b128, 2), 128)))
    tile_b = max(128, _round_up(int(tile_b), 128))
    b_pad = _round_up(B, tile_b)
    num_tiles = b_pad // tile_b

    # ---- transposed (batch-in-lanes) operands ------------------------------
    pad = b_pad - B
    obs_t = jnp.pad(obs.T, ((0, 0), (0, pad))).astype(compute_dtype)   # (obs_dim, B_pad)
    act_t = jnp.pad(act.T, ((0, 0), (0, pad))).astype(compute_dtype)   # (act_dim, B_pad)

    w1o_t = w1[:obs_dim].T.astype(compute_dtype)          # (h1, obs_dim)
    w1a_t = w1[obs_dim:].T.astype(compute_dtype)          # (h1, act_dim)
    w2_t = w2.T.astype(compute_dtype)                     # (h2, h1)
    w3_r = w3.reshape(1, h2_dim).astype(compute_dtype)    # (1, h2)
    b1_c = b1.reshape(h1_dim, 1).astype(jnp.float32)      # biases stay f32
    b2_c = b2.reshape(h2_dim, 1).astype(jnp.float32)
    b3_s = b3.reshape(1, 1).astype(jnp.float32)

    grid = (num_tiles,)

    def _stream(feat):
        # Streamed batch tiles, double-buffered by the BlockSpec pipeline.
        return pl.BlockSpec((feat, tile_b), lambda i: (0, i))

    def _resident(arr):
        # Constant block index -> DMA'd once, VMEM-resident for all grid steps.
        return pl.BlockSpec(arr.shape, lambda i: (0, 0))

    itemsize = jnp.dtype(compute_dtype).itemsize
    param_bytes = sum(int(a.size) * a.dtype.itemsize
                      for a in (w1o_t, w1a_t, b1_c, w2_t, b2_c, w3_r, b3_s))
    cost = pl.CostEstimate(
        flops=2 * b_pad * ((obs_dim + act_dim) * h1_dim + h1_dim * h2_dim + h2_dim),
        transcendentals=0,
        bytes_accessed=b_pad * (obs_dim + act_dim) * itemsize + param_bytes + b_pad * 4,
    )

    q = pl.pallas_call(
        _qfunc_kernel,
        out_shape=jax.ShapeDtypeStruct((1, b_pad), jnp.float32),
        grid=grid,
        in_specs=[
            _stream(obs_dim),        # obs^T  (streamed)
            _stream(act_dim),        # act^T  (streamed)
            _resident(w1o_t),        # W1[:obs_dim]^T
            _resident(w1a_t),        # W1[obs_dim:]^T
            _resident(b1_c),
            _resident(w2_t),
            _resident(b2_c),
            _resident(w3_r),
            _resident(b3_s),
        ],
        out_specs=pl.BlockSpec((1, tile_b), lambda i: (0, i)),  # lane-dense output row
        compiler_params=pltpu.CompilerParams(
            dimension_semantics=("parallel",)),   # v7x: shard batch over both TCs
        cost_estimate=cost,
    )(obs_t, act_t, w1o_t, w1a_t, b1_c, w2_t, b2_c, w3_r, b3_s)

    return q[0, :B]                  # drop padded columns; torch.squeeze(q, -1)


def init_params(key, obs_dim, act_dim, hidden_sizes):
    """Deterministic PyTorch-nn.Linear-style init: U(-1/sqrt(fan_in), 1/sqrt(fan_in))."""
    sizes = [obs_dim + act_dim] + list(hidden_sizes) + [1]
    params = []
    for j in range(len(sizes) - 1):
        fan_in, fan_out = sizes[j], sizes[j + 1]
        key, kw, kb = jax.random.split(key, 3)
        bound = 1.0 / jnp.sqrt(jnp.float32(fan_in))
        w = jax.random.uniform(kw, (fan_in, fan_out), jnp.float32, -bound, bound)
        b = jax.random.uniform(kb, (1, fan_out), jnp.float32, -bound, bound)
        params += [w, b]
    return tuple(params)


def _reference(obs, act, params):
    """Plain-JAX reference for correctness checking."""
    w1, b1, w2, b2, w3, b3 = params
    x = jnp.concatenate([obs, act], axis=-1)
    h1 = jnp.maximum(x @ w1 + b1, 0.0)
    h2 = jnp.maximum(h1 @ w2 + b2, 0.0)
    return jnp.squeeze(h2 @ w3 + b3, -1)


if __name__ == "__main__":
    key = jax.random.PRNGKey(0)
    k_obs, k_act, k_param = jax.random.split(key, 3)

    batch, obs_dim, act_dim = 200, 12, 4
    hidden_sizes = (32, 32)

    obs = jax.random.normal(k_obs, (batch, obs_dim), jnp.float32)
    act = jax.random.normal(k_act, (batch, act_dim), jnp.float32)
    params = init_params(k_param, obs_dim, act_dim, hidden_sizes)

    # tile_b=128 with batch=200 -> 2 grid steps + a zero-padded tail: exercises
    # pipelining, resident weights, and the padded-column path.
    q = jax.block_until_ready(mlp_q_function(obs, act, params, tile_b=128))
    q_ref = _reference(obs, act, params)

    assert q.shape == (batch,), q.shape
    assert jnp.allclose(q, q_ref, atol=1e-5, rtol=1e-5), (q, q_ref)
    print("KERNEL_OK")
</pallas_src>

<mosaic_0001>
module attributes {stable_mosaic.version = 11 : i64} {
  func.func @_qfunc_kernel(%arg0: i32, %arg1: memref<12x128xf32, #tpu.memory_space<vmem>>, %arg2: memref<4x128xf32, #tpu.memory_space<vmem>>, %arg3: memref<32x12xf32, #tpu.memory_space<vmem>>, %arg4: memref<32x4xf32, #tpu.memory_space<vmem>>, %arg5: memref<32x1xf32, #tpu.memory_space<vmem>>, %arg6: memref<32x32xf32, #tpu.memory_space<vmem>>, %arg7: memref<32x1xf32, #tpu.memory_space<vmem>>, %arg8: memref<1x32xf32, #tpu.memory_space<vmem>>, %arg9: memref<1x1xf32, #tpu.memory_space<vmem>>, %arg10: memref<1x128xf32, #tpu.memory_space<vmem>>) attributes {dimension_semantics = [#tpu.dimension_semantics<parallel>], iteration_bounds = array<i64: 2>, scalar_prefetch = 0 : i64, scratch_operands = 0 : i64, tpu.core_type = #tpu.core_type<tc>, window_params = [{transform_indices = @transform_0, window_bounds = array<i64: 12, 128>}, {transform_indices = @transform_1, window_bounds = array<i64: 4, 128>}, {pipeline_mode = #tpu.pipeline_mode<synchronous>, transform_indices = @transform_2, window_bounds = array<i64: 32, 12>}, {pipeline_mode = #tpu.pipeline_mode<synchronous>, transform_indices = @transform_3, window_bounds = array<i64: 32, 4>}, {pipeline_mode = #tpu.pipeline_mode<synchronous>, transform_indices = @transform_4, window_bounds = array<i64: 32, 1>}, {pipeline_mode = #tpu.pipeline_mode<synchronous>, transform_indices = @transform_5, window_bounds = array<i64: 32, 32>}, {pipeline_mode = #tpu.pipeline_mode<synchronous>, transform_indices = @transform_6, window_bounds = array<i64: 32, 1>}, {pipeline_mode = #tpu.pipeline_mode<synchronous>, transform_indices = @transform_7, window_bounds = array<i64: 1, 32>}, {pipeline_mode = #tpu.pipeline_mode<synchronous>, transform_indices = @transform_8, window_bounds = array<i64: 1, 1>}, {transform_indices = @transform_9, window_bounds = array<i64: 1, 128>}]} {
    %c0 = arith.constant 0 : index
    %c0_0 = arith.constant 0 : index
    %0 = vector.load %arg3[%c0, %c0_0] : memref<32x12xf32, #tpu.memory_space<vmem>>, vector<32x12xf32>
    %c0_1 = arith.constant 0 : index
    %c0_2 = arith.constant 0 : index
    %1 = vector.load %arg1[%c0_1, %c0_2] : memref<12x128xf32, #tpu.memory_space<vmem>>, vector<12x128xf32>
    %cst = arith.constant dense<0.000000e+00> : vector<32x128xf32>
    %2 = tpu.matmul %0, %1, %cst {dimension_numbers = #tpu.dot_dimension_numbers<[1], [0], [0], [1], [0, 0, 1, 1], [], []>} : vector<32x12xf32>, vector<12x128xf32>, vector<32x128xf32> -> vector<32x128xf32>
    %c0_3 = arith.constant 0 : index
    %c0_4 = arith.constant 0 : index
    %3 = vector.load %arg4[%c0_3, %c0_4] : memref<32x4xf32, #tpu.memory_space<vmem>>, vector<32x4xf32>
    %c0_5 = arith.constant 0 : index
    %c0_6 = arith.constant 0 : index
    %4 = vector.load %arg2[%c0_5, %c0_6] : memref<4x128xf32, #tpu.memory_space<vmem>>, vector<4x128xf32>
    %cst_7 = arith.constant dense<0.000000e+00> : vector<32x128xf32>
    %5 = tpu.matmul %3, %4, %cst_7 {dimension_numbers = #tpu.dot_dimension_numbers<[1], [0], [0], [1], [0, 0, 1, 1], [], []>} : vector<32x4xf32>, vector<4x128xf32>, vector<32x128xf32> -> vector<32x128xf32>
    %6 = arith.addf %2, %5 : vector<32x128xf32>
    %c0_8 = arith.constant 0 : index
    %c0_9 = arith.constant 0 : index
    %7 = vector.load %arg5[%c0_8, %c0_9] : memref<32x1xf32, #tpu.memory_space<vmem>>, vector<32x1xf32>
    %8 = vector.broadcast %7 : vector<32x1xf32> to vector<32x128xf32>
    %9 = arith.addf %6, %8 : vector<32x128xf32>
    %cst_10 = arith.constant 0.000000e+00 : f32
    %10 = vector.broadcast %cst_10 : f32 to vector<32x128xf32>
    %11 = arith.maximumf %9, %10 : vector<32x128xf32>
    %c0_11 = arith.constant 0 : index
    %c0_12 = arith.constant 0 : index
    %12 = vector.load %arg6[%c0_11, %c0_12] : memref<32x32xf32, #tpu.memory_space<vmem>>, vector<32x32xf32>
    %cst_13 = arith.constant dense<0.000000e+00> : vector<32x128xf32>
    %13 = tpu.matmul %12, %11, %cst_13 {dimension_numbers = #tpu.dot_dimension_numbers<[1], [0], [0], [1], [0, 0, 1, 1], [], []>} : vector<32x32xf32>, vector<32x128xf32>, vector<32x128xf32> -> vector<32x128xf32>
    %c0_14 = arith.constant 0 : index
    %c0_15 = arith.constant 0 : index
    %14 = vector.load %arg7[%c0_14, %c0_15] : memref<32x1xf32, #tpu.memory_space<vmem>>, vector<32x1xf32>
    %15 = vector.broadcast %14 : vector<32x1xf32> to vector<32x128xf32>
    %16 = arith.addf %13, %15 : vector<32x128xf32>
    %cst_16 = arith.constant 0.000000e+00 : f32
    %17 = vector.broadcast %cst_16 : f32 to vector<32x128xf32>
    %18 = arith.maximumf %16, %17 : vector<32x128xf32>
    %c0_17 = arith.constant 0 : index
    %c0_18 = arith.constant 0 : index
    %19 = vector.load %arg8[%c0_17, %c0_18] : memref<1x32xf32, #tpu.memory_space<vmem>>, vector<1x32xf32>
    %cst_19 = arith.constant dense<0.000000e+00> : vector<1x128xf32>
    %20 = tpu.matmul %19, %18, %cst_19 {dimension_numbers = #tpu.dot_dimension_numbers<[1], [0], [0], [1], [0, 0, 1, 1], [], []>} : vector<1x32xf32>, vector<32x128xf32>, vector<1x128xf32> -> vector<1x128xf32>
    %c0_20 = arith.constant 0 : index
    %c0_21 = arith.constant 0 : index
    %21 = vector.load %arg9[%c0_20, %c0_21] : memref<1x1xf32, #tpu.memory_space<vmem>>, vector<1x1xf32>
    %22 = vector.broadcast %21 : vector<1x1xf32> to vector<1x128xf32>
    %23 = arith.addf %20, %22 : vector<1x128xf32>
    %c0_22 = arith.constant 0 : index
    %c0_23 = arith.constant 0 : index
    %24 = vector.load %arg10[%c0_22, %c0_23] : memref<1x128xf32, #tpu.memory_space<vmem>>, vector<1x128xf32>
    tpu.vector_store %arg10[%c0_22, %c0_23], %23 {strides = array<i32>} : memref<1x128xf32, #tpu.memory_space<vmem>>, vector<1x128xf32>,
    return
  }
  func.func @transform_0(%arg0: i32) -> (i32, i32) {
    %c0_i32 = arith.constant 0 : i32
    %c0_i32_0 = arith.constant 0 : i32
    return %c0_i32, %arg0 : i32, i32
  }
  func.func @transform_1(%arg0: i32) -> (i32, i32) {
    %c0_i32 = arith.constant 0 : i32
    %c0_i32_0 = arith.constant 0 : i32
    return %c0_i32, %arg0 : i32, i32
  }
  func.func @transform_2(%arg0: i32) -> (i32, i32) {
    %c0_i32 = arith.constant 0 : i32
    %c0_i32_0 = arith.constant 0 : i32
    %c0_i32_1 = arith.constant 0 : i32
    return %c0_i32, %c0_i32_0 : i32, i32
  }
  func.func @transform_3(%arg0: i32) -> (i32, i32) {
    %c0_i32 = arith.constant 0 : i32
    %c0_i32_0 = arith.constant 0 : i32
    %c0_i32_1 = arith.constant 0 : i32
    return %c0_i32, %c0_i32_0 : i32, i32
  }
  func.func @transform_4(%arg0: i32) -> (i32, i32) {
    %c0_i32 = arith.constant 0 : i32
    %c0_i32_0 = arith.constant 0 : i32
    %c0_i32_1 = arith.constant 0 : i32
    return %c0_i32, %c0_i32_0 : i32, i32
  }
  func.func @transform_5(%arg0: i32) -> (i32, i32) {
    %c0_i32 = arith.constant 0 : i32
    %c0_i32_0 = arith.constant 0 : i32
    %c0_i32_1 = arith.constant 0 : i32
    return %c0_i32, %c0_i32_0 : i32, i32
  }
  func.func @transform_6(%arg0: i32) -> (i32, i32) {
    %c0_i32 = arith.constant 0 : i32
    %c0_i32_0 = arith.constant 0 : i32
    %c0_i32_1 = arith.constant 0 : i32
    return %c0_i32, %c0_i32_0 : i32, i32
  }
  func.func @transform_7(%arg0: i32) -> (i32, i32) {
    %c0_i32 = arith.constant 0 : i32
    %c0_i32_0 = arith.constant 0 : i32
    %c0_i32_1 = arith.constant 0 : i32
    return %c0_i32, %c0_i32_0 : i32, i32
  }
  func.func @transform_8(%arg0: i32) -> (i32, i32) {
    %c0_i32 = arith.constant 0 : i32
    %c0_i32_0 = arith.constant 0 : i32
    %c0_i32_1 = arith.constant 0 : i32
    return %c0_i32, %c0_i32_0 : i32, i32
  }
  func.func @transform_9(%arg0: i32) -> (i32, i32) {
    %c0_i32 = arith.constant 0 : i32
    %c0_i32_0 = arith.constant 0 : i32
    return %c0_i32, %arg0 : i32, i32
  }
}

</mosaic_0001>

<bundles_post_ra>
// kernel: tpu_custom_call.1
= control target key start
LH: loop header
LB: loop body
LE: loop exit
PB: predicated region body
PF: predicated region fallthrough
CT: control target
= control target key end

     0   :  { %s1414_s0 = inlined_call_operand.vmem [shape: f32[12,256], index: 0, kind: input, shape index: {}]   ;;  %s1415_s1 = inlined_call_operand.vmem [shape: f32[4,256], index: 1, kind: input, shape index: {}]   ;;  %s1416_s2 = inlined_call_operand.vmem [shape: f32[32,12], index: 2, kind: input, shape index: {}]   ;;  %s1417_s3 = inlined_call_operand.vmem [shape: f32[32,4], index: 3, kind: input, shape index: {}]   ;;  %s1418_s4 = inlined_call_operand.vmem [shape: f32[32,1], index: 4, kind: input, shape index: {}]   ;;  %s1419_s5 = inlined_call_operand.vmem [shape: f32[32,32], index: 5, kind: input, shape index: {}]   ;;  %s1420_s6 = inlined_call_operand.vmem [shape: f32[32,1], index: 6, kind: input, shape index: {}]   ;;  %s1421_s7 = inlined_call_operand.vmem [shape: f32[1,32], index: 7, kind: input, shape index: {}]   ;;  %s1422_s8 = inlined_call_operand.<no memory space> [shape: f32[1,1], index: 8, kind: input, shape index: {}]   ;;  %s1423_s9 = inlined_call_operand.hbm [shape: f32[1,256], index: 9, kind: output, shape index: {}]  }
   0x1   :  { %1424 = sst [smem:[#allocation7_spill]] %s1414_s0  ;;  %v14_v0 = vstv %s1422_s8 }
   0x2   :  { %15 = vst [vmem:[#allocation2] sm:$0x1] %v14_v0 }
   0x3   :  { %16 = vsyncpa [#allocation5], 0 }
   0x4   :  { %18 = vsyncpa [#allocation5 + $0x1], 0  ;;  %s1220_s11 = smov 0   ;;  %s1222_s12 = smov 0  }
   0x5   :  { %s1224_s13 = smov 0   ;;  %s1226_s14 = smov 0  }
   0x6 LB: > { %s1241_s8 = sadd.s32 4294967295, %s1159_s14   ;;  %s934_s15 = sadd.s32 4294967294, %s1159_s14   ;;  %s1159_s14 = sphi %s1226_s14, %s1431_s14   ;;  %s1155_s13 = sphi %s1224_s13, %s1430_s13   ;;  %s1151_s12 = sphi %s1222_s12, %s1429_s12   ;;  %s1147_s11 = sphi %s1220_s11, %s1428_s11  }
   0x7   : > { %s1245_s16 = sadd.s32 1, %s1159_s14   ;;  %s31_s17 = sadd.s32 1, %s1155_s13 }
   0x8   : > { %s28_s18 = ssub.s32 %s1159_s14, %s1245_s16  ;;  %p38_p0 = scmp.ne.s32.totalorder %s1155_s13, %s1151_s12 }
   0x9   : > { %p29_p1 = scmp.eq.s32.totalorder %s28_s18, 0  ;;  %p39_p2 = scmp.eq.s32.totalorder %s1159_s14, 0 }
   0xa   : > { %p241_p3 = scmp.eq.s32.totalorder %s1241_s8, 1  ;;  %p246_p4 = scmp.ne.s32.totalorder %s1151_s12, %s1147_s11 }
   0xb   : > { %s1257_s19 = scalar_select %p29_p1, %s1155_s13, %s31_s17  }
   0xc   : > { %p40_p5 = por %p39_p2, %p38_p0  ;;  %p1259_p6 = por %p241_p3, %p38_p0 }
   0xd   : > { %p247_p7 = scmp.eq.s32.totalorder %s934_s15, 1  ;;  %p936_p9 = scmp.ge.s32.totalorder %s1159_s14, 2 }
   0xf   : > { %p1263_p8 = por %p247_p7, %p246_p4  ;;  %284 = sbr.rel (%p936_p9) target bundleno = 33 (0x21), region = 44 }
  0x16   : > { %287 = sbr.rel (!%p40_p5) target bundleno = 33 (0x21), region = 48  ;;  %s289_s22 = sand.u32 (%p40_p5), 1, %s1155_s13  }
  0x17   : > { %s938_s23 = sshll.u32 (%p40_p5), %s1159_s14, 3  ;;  %s937_s24 = sshll.u32 (%p40_p5), %s289_s22, 4 }
  0x18   : > { %s1427_s0 = sld [smem:[#allocation7_spill]] (%p40_p5)  ;;  %s291_s28 = scalar_lea.vmem (%p40_p5), [#allocation3], %s937_s24 }
  0x1e   : > { %s293_s27 = scalar_lea.vmem %s1427_s0, %s938_s23 }
  0x1f   : > { %v323_v1 = vld [vmem:[%s293_s27] sm:$0xff]  ;;  %v325_v2 = vld [vmem:[%s293_s27 + $0x10] sm:$0xff] }
  0x20   : > { %324 = vst [vmem:[%s291_s28] sm:$0xff] %v323_v1  ;;  %326 = vst [vmem:[%s291_s28 + $0x8] sm:$0xff] %v325_v2 }
  0x21 PF: > { %p939_p10 = scmp.ge.s32.totalorder %s1159_s14, 1  ;;  %p338_p11 = scmp.lt.s32.totalorder %s1159_s14, 3 }
  0x23   : > { %p339_p12 = pnand %p939_p10, %p338_p11 }
  0x24   : > { %p383_p13 = scmp.lt.s32.totalorder (!%p339_p12), %s1241_s8, 1  ;;  %v393_v3 = vld [vmem:[%s1417_s3] sm:$0xff] (!%p339_p12)  ;;  %vm398_vm0 = vcmask (!%p339_p12), 31744   ;;  %s1282_s10 = sand.u32 (!%p339_p12), 1, %s1151_s12   ;;  %v1161_v4 = vmov (!%p339_p12), 0   ;;  %vm411_vm1 = vcmask (!%p339_p12), 1043456  }
  0x25   : > { %342 = sbr.rel (%p339_p12) target bundleno = 740 (0x2e4), region = 90  ;;  %986 = vmatprep.mubr.msk.f32.mxu0 (!%p339_p12), %vm398_vm0, %v393_v3  ;;  %s940_s15 = sshll.u32 (!%p339_p12), %s1282_s10, 4  ;;  %1095 = vset.pattern.permute.xlu0 (!%p339_p12), %v1161_v4  ;;  %v601_v5 = vld [vmem:[%s1418_s4] sm:$0xff] (!%p339_p12)  ;;  %v603_v8 = vld [vmem:[%s1418_s4 + $0x10] sm:$0xff] (!%p339_p12)  ;;  %v602_v10 = vld [vmem:[%s1418_s4 + $0x8] sm:$0xff] (!%p339_p12)  ;;  %vm1162_vm2 = vmmov (!%p339_p12), 1  }
  0x26   : > { %1096 = vset.pattern.permute.xlu1 (!%p339_p12), %v1161_v4  ;;  %s347_s24 = scalar_lea.vmem (!%p339_p12), [#allocation3], %s940_s15  ;;  %607 = vperm.xlu0 (!%p339_p12), %1095, %v601_v5   ;;  %v394_v12 = vld [vmem:[%s1417_s3 + $0x8] sm:$0xff] (!%p339_p12)  ;;  %vm1028_vm3 = vmpackc.low (!%p339_p12), %vm411_vm1, %vm1162_vm2  ;;  %v395_v13 = vld [vmem:[%s1417_s3 + $0x10] sm:$0xff] (!%p339_p12)  ;;  %vm500_vm4 = vcmask (!%p339_p12), 97280   ;;  %vm661_vm5 = vcmask (!%p339_p12), 261120   ;;  %v1163_v47 = vmov (!%p339_p12), 0.0|0.0   ;;  %v770_v4 = vlaneseq (!%p339_p12) }
  0x27   : > { %v391_v6 = vld [vmem:[%s347_s24] sm:$0xff] (!%p339_p12)  ;;  %v392_v7 = vld [vmem:[%s347_s24 + $0x8] sm:$0xf] (!%p339_p12)  ;;  %617 = vperm.xlu1 (!%p339_p12), %1096, %v603_v8   ;;  %v764_v23 = vld [vmem:[#allocation2] sm:$0x1] (!%p339_p12)  ;;  %vm1164_vm6 = vmmov (!%p339_p12), 0  }
  0x28   : > { %v1027_v9 = vpack.c.bf16 (!%p339_p12), %v392_v7, %v391_v6  ;;  %v604_v14 = vld [vmem:[%s1418_s4 + $0x18] sm:$0xff] (!%p339_p12)  ;;  %v637_v15 = vld [vmem:[%s1420_s6] sm:$0xff] (!%p339_p12)  ;;  %v638_v18 = vld [vmem:[%s1420_s6 + $0x8] sm:$0xff] (!%p339_p12)  ;;  %v1165_v48 = vmov (!%p339_p12), 0.0   ;;  %v771_v5 = vshrl.u32 (!%p339_p12), %v770_v4, 7  ;;  %s957_s26 = sshll.u32 (!%p339_p12), %s1241_s8, 4 }
  0x29   : > { %v396_v16 = vld [vmem:[%s1417_s3 + $0x18] sm:$0xff] (!%p339_p12)  ;;  %v387_v17 = vld [vmem:[%s1416_s2] sm:$0xff] (!%p339_p12)  ;;  %v639_v19 = vld [vmem:[%s1420_s6 + $0x10] sm:$0xff] (!%p339_p12)  ;;  %s382_s27 = scalar_lea.vmem (!%p339_p12), [#allocation4], %s1282_s10  ;;  %s849_s15 = scalar_lea.sflag (!%p339_p12), [#allocation5], %s1282_s10 }
  0x2a   : > { %612 = vperm.xlu0 (!%p339_p12), %1095, %v602_v10   ;;  %v388_v20 = vld [vmem:[%s1416_s2 + $0x8] sm:$0xff] (!%p339_p12)  ;;  %v389_v21 = vld [vmem:[%s1416_s2 + $0x10] sm:$0xff] (!%p339_p12)  ;;  %v640_v22 = vld [vmem:[%s1420_s6 + $0x18] sm:$0xff] (!%p339_p12)  ;;  %v772_v6 = vsub.s32 (!%p339_p12), 0, %v771_v5  ;;  %s861_s28 = sshll.u32 (!%p339_p12), %s382_s27, 4  ;;  %s1372_s28 = int_to_ptr.vmem [resolvable:$true] %s861_s28 }
  0x2b   : > { %622 = vperm.xlu1 (!%p339_p12), %1096, %v604_v14   ;;  %v390_v24 = vld [vmem:[%s1416_s2 + $0x18] sm:$0xff] (!%p339_p12)  ;;  %v633_v25 = vld [vmem:[%s1419_s5] sm:$0xff] (!%p339_p12)  ;;  %v634_v44 = vld [vmem:[%s1419_s5 + $0x8] sm:$0xff] (!%p339_p12)  ;;  %s1097_s18 = scalar_lea.vmem (!%p339_p12), %s1372_s28, 16 }
  0x2c   : > { %s384_s17 = scalar_select %p383_p13, %s1241_s8, 1  ;;  %1010 = vmatprep.mubr.msk.f32.mxu1 %vm661_vm5, %v633_v25  ;;  %v635_v45 = vld [vmem:[%s1419_s5 + $0x10] sm:$0xff]  ;;  %v636_v46 = vld [vmem:[%s1419_s5 + $0x18] sm:$0xff]  ;;  %v763_v3 = vld [vmem:[%s1421_s7] sm:$0x1] }
  0x2d   : > { %p1098_p0 = scmp.ne.s32.totalorder %s1372_s28, %s1097_s18  ;;  %s1166_s8 = smov [#allocation4]  }
  0x2e   : > { %s941_s23 = sshll.u32 %s384_s17, 2  ;;  %643 = vperm.xlu0 %1095, %v637_v15   ;;  %s1370_s17 = scalar_lea.hbm %s1423_s9, %s957_s26 }
  0x2f   : > { %s386_s29 = scalar_lea.vmem %s1415_s1, %s941_s23  ;;  %648 = vperm.xlu1 %1096, %v638_v18   ;;  %p1099_p1 = pnand %p1098_p0, %p1259_p6 }
  0x30   : > { %v397_v11 = vld [vmem:[%s386_s29] sm:$0xf]  ;;  %s1101_s22 = sshll.u32 %s1166_s8, 4  ;;  %s1102_s22 = int_to_ptr.vmem [resolvable:$false] %s1101_s22 }
  0x31   : > { %984 = vmatprep.subr.msk.mxu0 %vm411_vm1, %v397_v11  ;;  %p1100_p2 = pneg %p1099_p1  ;;  %s1103_s0 = scalar_lea.vmem %s1102_s22, 32 }
  0x32   : > { %985 = vmatpush3.msk.msra.mxu0 %vm411_vm1, %v397_v11  ;;  %653 = vperm.xlu0 %1095, %v639_v19   ;;  %p1104_p3 = scmp.lt.s32.totalorder %s1372_s28, %s1102_s22  ;;  %p1105_p4 = scmp.lt.s32.totalorder %s1103_s0, %s1097_s18 }
  0x33   : > { %987 = vmatmul.mubr.msk.f32.vlgmr.msra.gmra.mrb[0].mxu0 %vm398_vm0, %v394_v12  ;;  %1029 = vmatprep.subr.msk.bf16.mxu0 %vm1028_vm3, %v1027_v9 }
  0x34   : > { %1032 = vmatpush3.bf16.msk.msra.mxu0 %vm1028_vm3, %v1027_v9  ;;  %989 = vmatprep.mubr.msk.f32.mxu0 %vm398_vm0, %v395_v13  ;;  %p1106_p5 = por %p1105_p4, %p1104_p3 }
  0x35   : > { %658 = vperm.xlu1 %1096, %v640_v22  }
  0x36   : > { %767 = vperm.xlu0 %1095, %v764_v23   ;;  %p1107_p7 = pnand %p1106_p5, %p1100_p2 }
  0x37   : > { %990 = vmatmul.mubr.msk.f32.gmra.mrb[2].mxu0 %vm398_vm0, %v396_v16 }
  0x38   : > { %996 = vmatprep.mubr.msk.f32.mxu0 %vm500_vm4, %v387_v17 }
  0x3b   : > { %997 = vmatmul.mubr.msk.f32.vlgmr.msra.gmra.mrb[0].mxu0 %vm500_vm4, %v388_v20 }
  0x3c   : > { %999 = vmatprep.mubr.msk.f32.mxu0 %vm500_vm4, %v389_v21 }
  0x3f   : > { %1000 = vmatmul.mubr.msk.f32.gmra.mrb[2].mxu0 %vm500_vm4, %v390_v24 }
  0xa5   : > { %v608_v26 = vpop.permute.xlu0 %607 }
  0xa6   : > { %v618_v27 = vpop.permute.xlu1 %617 }
  0xa9   : > { %v613_v28 = vpop.permute.xlu0 %612 }
  0xaa   : > { %v623_v34 = vpop.permute.xlu1 %622 }
  0xad   : > { %v644_v50 = vpop.permute.xlu0 %643 }
  0xae   : > { %v649_v49 = vpop.permute.xlu1 %648 }
  0xb1   : > { %v654_v59 = vpop.permute.xlu0 %653 }
  0xb4   : > { %v659_v56 = vpop.permute.xlu1 %658 }
  0xb5   : > { %v768_v7 = vpop.permute.xlu0 %767 }
  0xb6   : > { %v773_v8 = vrot.slane %v768_v7, %v772_v6 }
 0x10e   : > { %v998_v29 = vpop.f32.mrb[0].mxu0 }
 0x10f   : > { %v626_v30 = vadd.f32 %v998_v29, %v613_v28  ;;  %v582_v31 = vpop.f32.mrb[1].mxu0 }
 0x110   : > { %v625_v32 = vadd.f32 %v608_v26, %v582_v31 }
 0x111   : > { %v630_v33 = vmax.f32 %v626_v30, 0.0 }
 0x112   : > { %v629_v35 = vmax.f32 %v625_v32, 0.0  ;;  %v1001_v36 = vpop.f32.mrb[2].mxu0 }
 0x113   : > { %v628_v37 = vadd.f32 %v1001_v36, %v623_v34  ;;  %v592_v38 = vpop.f32.mrb[3].mxu0 }
 0x114   : > { %v627_v39 = vadd.f32 %v618_v27, %v592_v38  ;;  %v1033_v40 = vpack.c.bf16 %v630_v33, %v629_v35 }
 0x115   : > { %v632_v41 = vmax.f32 %v628_v37, 0.0 }
 0x116   : > { %v631_v42 = vmax.f32 %v627_v39, 0.0  ;;  %1034 = vmatprep.subr.bf16.mxu1 %v1033_v40 }
 0x117   : > { %1036 = vmatpush3.bf16.msra.mxu1 %v1033_v40 }
 0x118   : > { %v1037_v43 = vpack.c.bf16 %v632_v41, %v631_v42 }
 0x11a   : > { %1038 = vmatprep.subr.bf16.mxu1 %v1037_v43 }
 0x11b   : > { %1040 = vmatpush3.bf16.msra.mxu1 %v1037_v43 }
 0x11c   : > { %1041 = vmatprep.subr.bf16.mxu1 %v1163_v47 }
 0x11e   : > { %1011 = vmatmul.mubr.msk.f32.vlgmr.msra.gmra.mrb[0].mxu1 %vm661_vm5, %v634_v44 }
 0x11f   : > { %1013 = vmatprep.mubr.msk.f32.mxu1 %vm661_vm5, %v635_v45 }
 0x122   : > { %1014 = vmatmul.mubr.msk.f32.gmra.mrb[2].mxu1 %vm661_vm5, %v636_v46 }
 0x123   : > { %1024 = vmatprep.mubr.msk.f32.mxu1 %vm1164_vm6, %v1165_v48 }
 0x1f1   : > { %v1012_v51 = vpop.f32.mrb[0].mxu1 }
 0x1f2   : > { %v746_v52 = vadd.f32 %v1012_v51, %v649_v49  ;;  %v740_v53 = vpop.f32.mrb[1].mxu1 }
 0x1f3   : > { %v741_v54 = vadd.f32 %v740_v53, %v644_v50 }
 0x1f4   : > { %v760_v55 = vmax.f32 %v746_v52, 0.0 }
 0x1f5   : > { %v759_v57 = vmax.f32 %v741_v54, 0.0  ;;  %v1015_v58 = vpop.f32.mrb[2].mxu1 }
 0x1f6   : > { %v756_v60 = vadd.f32 %v1015_v58, %v659_v56  ;;  %v750_v61 = vpop.f32.mrb[3].mxu1 }
 0x1f7   : > { %v1042_v62 = vpack.c.bf16 %v760_v55, %v759_v57  ;;  %v751_v63 = vadd.f32 %v750_v61, %v654_v59 }
 0x1f8   : > { %v762_v0 = vmax.f32 %v756_v60, 0.0 }
 0x1f9   : > { %v761_v1 = vmax.f32 %v751_v63, 0.0  ;;  %1043 = vmatpush3.bf16.msra.mxu1 %v1042_v62 }
 0x1fa   : > { %1044 = vmatprep.subr.bf16.mxu1 %v1163_v47 }
 0x1fb   : > { %v1045_v2 = vpack.c.bf16 %v762_v0, %v761_v1 }
 0x1fd   : > { %1046 = vmatpush3.bf16.msra.mxu1 %v1045_v2 }
 0x200   : > { %1025 = vmatmul.mubr.msk.f32.vlgmr.msra.gmra.mrb[4].mxu1 %vm661_vm5, %v763_v3 }
 0x2d3   : > { %v843_v9 = vpop.f32.mrb[4].mxu1 }
 0x2d4   : > { %v844_v10 = vadd.f32 %v843_v9, %v773_v8  ;;  %v1026_v11 = vpop.f32.mrb[5].mxu1 }
 0x2d6   : > { %847 = vst [vmem:[%s382_s27] sm:$0x1] %v844_v10 }
 0x2d7   : > { %1110 = shalt.err (!%p1107_p7)
}
 0x2d8   : > { %s1111_s10 = scalar_lea.hbm %s1370_s17, 16  ;;  %s1115_s25 = scalar_lea.hbm %s1423_s9, 32 }
 0x2d9   : > { %p1112_p10 = scmp.ne.s32.totalorder %s1370_s17, %s1111_s10  ;;  %p1116_p13 = scmp.lt.u32.totalorder %s1370_s17, %s1423_s9 }
 0x2da   : > { %p1117_p0 = scmp.lt.u32.totalorder %s1115_s25, %s1111_s10  ;;  %p1119_p2 = scmp.lt.u32.totalorder %s1111_s10, %s1370_s17 }
 0x2db   : > { %p1113_p11 = pnand %p1112_p10, %p1259_p6 }
 0x2dc   : > { %p1118_p1 = por %p1117_p0, %p1116_p13 }
 0x2dd   : > { %p1114_p12 = pneg %p1113_p11 }
 0x2de   : > { %p1120_p3 = por %p1119_p2, %p1118_p1 }
 0x2e0   : > { %p1121_p4 = pnand %p1120_p3, %p1114_p12 }
 0x2e2   : > { %1124 = shalt.err (!%p1121_p4)
}
 0x2e3   : > { %1051 = dma.vmem_to_hbm [thread:$0]  (%p1259_p6), %s1372_s28, 16, %s1370_s17, %s849_s15  }
 0x2e4 PF: > { %s873_s29 = sand.u32 1, %s1147_s11   ;;  %p1054_p5 = pnand %p936_p9, %p1263_p8 }
 0x2e5   : > { %s874_s30 = scalar_lea.sflag [#allocation5], %s873_s29 }
 0x2e6   : > { %1142 = dma.done.wait (!%p1054_p5), %s874_s30, 16  }
 0x2e7   : > { %1144 = vsyncadd (!%p1054_p5), %s874_s30, 4294967280  ;;  %p21_p7 = scmp.ge.s32.totalorder %s1245_s16, 4   ;;  %s1428_s11 = smov %s1151_s12 }
 0x2e8   : > { %s1429_s12 = smov %s1155_s13  ;;  %s1430_s13 = smov %s1257_s19 }
 0x2e9   : > { %s1431_s14 = smov %s1245_s16  ;;  %23 = sbr.rel (!%p21_p7) target bundleno = 6 (0x6), region = 137 }
 0x2f0   :  { %878 = vsyncpa [#allocation5], 1 }
 0x2f1   :  { %880 = vsyncpa [#allocation5 + $0x1], 1 }

</bundles_post_ra>
